<compile_context>
chip_gen: v6e
topology: v6e:2x2x1
jax: 0.10.0
libtpu: 0.0.40
codegen_flags: <defaults>
</compile_context>

<pallas_src>
import jax
import jax.numpy as jnp
from jax.experimental import pallas as pl
from jax.experimental.pallas import tpu as pltpu

B = 2            # batch
X_DIM = 64       # encoder input feature dim
ENC_LATENT = 16  # encoder.latent_dim (synthetic encoder)
Z_DIM = 32       # z_latent_dim
FULL = ENC_LATENT + Z_DIM   # full_latent_dim = 48
H = 64
OUT = 128
LANE = 128       # TPU lane width; every padded weight tile is 128 wide
SUB = 8          # sublane count; batch is padded to a multiple of this


def _sigmoid_f32(v):
    # logistic(v) = 0.5*tanh(0.5*v) + 0.5 : one EUP op per stage, exact (no
    # approx reciprocal); mul/add filler rides idle VALU slots. Stays f32.
    return 0.5 * jnp.tanh(0.5 * v) + 0.5


def cond_gen_kernel(x_ref, z_ref, w_ref, b_ref, out_ref):
    # Static, sublane-aligned views into the packed weight slab (no masking).
    w_x = w_ref[0:X_DIM, :]                 # encoder W, cols 0:16 used
    w_z = w_ref[X_DIM:X_DIM + Z_DIM, :]     # z_latent W, cols 16:48 used
    w1 = w_ref[LANE:2 * LANE, :]            # out_dense_1, zero-padded 128x128
    w2 = w_ref[2 * LANE:3 * LANE, :]        # out_dense_2, zero-padded 128x128
    w3 = w_ref[3 * LANE:4 * LANE, :]        # out_dense_3, zero-padded 128x128

    b = b_ref[...]                          # (8, 128) f32, one vreg
    b0 = b[0:1, :]                          # [be | bz | 0]
    b1 = b[1:2, :]
    b2 = b[2:3, :]

    x = x_ref[...].astype(jnp.bfloat16)     # (Bp, 64)
    z = z_ref[...].astype(jnp.bfloat16)     # (Bp, 32)

    # Stage 0: encoder Linear + z_latent_dense as two accumulating MXU dots
    # into disjoint output columns (0:16 and 16:48), then sigmoid.
    h = _sigmoid_f32(
        jnp.dot(x, w_x, preferred_element_type=jnp.float32)
        + jnp.dot(z, w_z, preferred_element_type=jnp.float32)
        + b0)
    # Stage 1: out_dense_1 + sigmoid (concat already realized in lane layout;
    # zero weight rows 48:128 annihilate the sigmoid(0)=0.5 padding columns).
    h = _sigmoid_f32(
        jnp.dot(h.astype(jnp.bfloat16), w1,
                preferred_element_type=jnp.float32) + b1)
    # Stage 2: out_dense_2 + sigmoid
    h = _sigmoid_f32(
        jnp.dot(h.astype(jnp.bfloat16), w2,
                preferred_element_type=jnp.float32) + b2)
    # Stage 3: out_dense_3 (no bias, no activation)
    out_ref[...] = jnp.dot(h.astype(jnp.bfloat16), w3,
                           preferred_element_type=jnp.float32)


@jax.jit
def conditional_generator_forward(z, x, params):
    """Forward of ConditionalGenerator. Returns (B, 1, 128, 1) like PyTorch."""
    bsz = x.shape[0]
    bp = max(SUB, ((bsz + SUB - 1) // SUB) * SUB)   # pad batch to full sublanes
    xp = jnp.zeros((bp, X_DIM), jnp.float32).at[:bsz].set(x)
    zp = jnp.zeros((bp, Z_DIM), jnp.float32).at[:bsz].set(z)

    w_slab = params["w_slab"]
    b_slab = params["b_slab"]

    vmem = pl.BlockSpec(memory_space=pltpu.MemorySpace.VMEM)
    cost = pl.CostEstimate(
        flops=2 * 4 * bp * LANE * LANE,
        transcendentals=3 * bp * LANE,
        bytes_accessed=(w_slab.size * 2 + b_slab.size * 4
                        + bp * (X_DIM + Z_DIM) * 4 + bp * OUT * 4),
    )

    out2d = pl.pallas_call(
        cond_gen_kernel,
        out_shape=jax.ShapeDtypeStruct((bp, OUT), jnp.float32),
        in_specs=[vmem, vmem, vmem, vmem],
        out_specs=vmem,
        cost_estimate=cost,
    )(xp, zp, w_slab, b_slab)

    # PyTorch epilogue:
    #   view(B,128,1) -> transpose(1,2) -> unsqueeze(1) -> transpose(-2,-1)
    # is a pure metadata permutation of contiguous (B,128); one reshape suffices.
    return out2d[:bsz].reshape(bsz, 1, OUT, 1)


def _linear_init(key, fan_in, fan_out, bias=True):
    """Deterministic init mimicking PyTorch nn.Linear default (U[-1/sqrt(fan_in), +])."""
    kw, kb = jax.random.split(key)
    bound = 1.0 / jnp.sqrt(fan_in)
    w = jax.random.uniform(kw, (fan_in, fan_out), jnp.float32, -bound, bound)
    if bias:
        b = jax.random.uniform(kb, (1, fan_out), jnp.float32, -bound, bound)
        return w, b
    return w, None


def make_params(key):
    keys = jax.random.split(key, 5)
    we, be = _linear_init(keys[0], X_DIM, ENC_LATENT)   # synthetic encoder Linear
    wz, bz = _linear_init(keys[1], Z_DIM, Z_DIM)        # z_latent_dense
    w1, b1 = _linear_init(keys[2], FULL, H)             # out_dense_1
    w2, b2 = _linear_init(keys[3], H, H)                # out_dense_2
    w3, _ = _linear_init(keys[4], H, OUT, bias=False)   # out_dense_3 (no bias)

    # Single packed weight slab: 4 stacked 128x128 tiles, zero-padded.
    #   rows   0: 64  encoder W   -> cols  0:16
    #   rows  64: 96  z_latent W  -> cols 16:48
    #   rows 128:256  out_dense_1 (rows 0:48, cols 0:64 used)
    #   rows 256:384  out_dense_2 (rows 0:64, cols 0:64 used)
    #   rows 384:512  out_dense_3 (rows 0:64, cols 0:128 used)
    # Zero rows cancel the 0.5 garbage that sigmoid produces in the padding
    # columns of the previous stage.
    w_slab = jnp.zeros((4 * LANE, LANE), jnp.float32)
    w_slab = w_slab.at[0:X_DIM, 0:ENC_LATENT].set(we)
    w_slab = w_slab.at[X_DIM:X_DIM + Z_DIM, ENC_LATENT:FULL].set(wz)
    w_slab = w_slab.at[LANE:LANE + FULL, 0:H].set(w1)
    w_slab = w_slab.at[2 * LANE:2 * LANE + H, 0:H].set(w2)
    w_slab = w_slab.at[3 * LANE:3 * LANE + H, 0:OUT].set(w3)
    w_slab = w_slab.astype(jnp.bfloat16)                 # MXU-native

    # Single f32 bias slab (one vreg): row 0 = [be|bz], row 1 = b1, row 2 = b2.
    b_slab = jnp.zeros((SUB, LANE), jnp.float32)
    b_slab = b_slab.at[0, :ENC_LATENT].set(be[0])
    b_slab = b_slab.at[0, ENC_LATENT:FULL].set(bz[0])
    b_slab = b_slab.at[1, :H].set(b1[0])
    b_slab = b_slab.at[2, :H].set(b2[0])

    return {"w_slab": w_slab, "b_slab": b_slab}


if __name__ == "__main__":
    key = jax.random.PRNGKey(0)
    k_params, k_x, k_z = jax.random.split(key, 3)

    params = make_params(k_params)
    x = jax.random.normal(k_x, (B, X_DIM), jnp.float32)
    z = jax.random.normal(k_z, (B, Z_DIM), jnp.float32)

    out = conditional_generator_forward(z, x, params)
    jax.block_until_ready(out)
    assert out.shape == (B, 1, OUT, 1), out.shape
    print("KERNEL_OK")
</pallas_src>

<mosaic_0001>
module attributes {stable_mosaic.version = 11 : i64} {
  func.func @cond_gen_kernel(%arg0: memref<8x64xf32, #tpu.memory_space<vmem>>, %arg1: memref<8x32xf32, #tpu.memory_space<vmem>>, %arg2: memref<512x128xbf16, #tpu.memory_space<vmem>>, %arg3: memref<8x128xf32, #tpu.memory_space<vmem>>, %arg4: memref<8x128xf32, #tpu.memory_space<vmem>>) attributes {dimension_semantics = [], scalar_prefetch = 0 : i64, scratch_operands = 0 : i64, tpu.core_type = #tpu.core_type<tc>} {
    %c0 = arith.constant 0 : index
    %c0_0 = arith.constant 0 : index
    %0 = vector.load %arg2[%c0, %c0_0] : memref<512x128xbf16, #tpu.memory_space<vmem>>, vector<64x128xbf16>
    %c64 = arith.constant 64 : index
    %c0_1 = arith.constant 0 : index
    %1 = vector.load %arg2[%c64, %c0_1] : memref<512x128xbf16, #tpu.memory_space<vmem>>, vector<32x128xbf16>
    %c128 = arith.constant 128 : index
    %c0_2 = arith.constant 0 : index
    %2 = vector.load %arg2[%c128, %c0_2] : memref<512x128xbf16, #tpu.memory_space<vmem>>, vector<128x128xbf16>
    %c256 = arith.constant 256 : index
    %c0_3 = arith.constant 0 : index
    %3 = vector.load %arg2[%c256, %c0_3] : memref<512x128xbf16, #tpu.memory_space<vmem>>, vector<128x128xbf16>
    %c384 = arith.constant 384 : index
    %c0_4 = arith.constant 0 : index
    %4 = vector.load %arg2[%c384, %c0_4] : memref<512x128xbf16, #tpu.memory_space<vmem>>, vector<128x128xbf16>
    %c0_5 = arith.constant 0 : index
    %c0_6 = arith.constant 0 : index
    %5 = vector.load %arg3[%c0_5, %c0_6] : memref<8x128xf32, #tpu.memory_space<vmem>>, vector<8x128xf32>
    %6 = vector.extract_strided_slice %5 {offsets = [0, 0], sizes = [1, 128], strides = [1, 1]} : vector<8x128xf32> to vector<1x128xf32>
    %7 = vector.extract_strided_slice %5 {offsets = [1, 0], sizes = [1, 128], strides = [1, 1]} : vector<8x128xf32> to vector<1x128xf32>
    %8 = vector.extract_strided_slice %5 {offsets = [2, 0], sizes = [1, 128], strides = [1, 1]} : vector<8x128xf32> to vector<1x128xf32>
    %c0_7 = arith.constant 0 : index
    %c0_8 = arith.constant 0 : index
    %9 = vector.load %arg0[%c0_7, %c0_8] : memref<8x64xf32, #tpu.memory_space<vmem>>, vector<8x64xf32>
    %10 = arith.truncf %9 : vector<8x64xf32> to vector<8x64xbf16>
    %c0_9 = arith.constant 0 : index
    %c0_10 = arith.constant 0 : index
    %11 = vector.load %arg1[%c0_9, %c0_10] : memref<8x32xf32, #tpu.memory_space<vmem>>, vector<8x32xf32>
    %12 = arith.truncf %11 : vector<8x32xf32> to vector<8x32xbf16>
    %cst = arith.constant dense<0.000000e+00> : vector<8x128xf32>
    %13 = tpu.matmul %10, %0, %cst {dimension_numbers = #tpu.dot_dimension_numbers<[1], [0], [0], [1], [0, 0, 1, 1], [], []>} : vector<8x64xbf16>, vector<64x128xbf16>, vector<8x128xf32> -> vector<8x128xf32>
    %cst_11 = arith.constant dense<0.000000e+00> : vector<8x128xf32>
    %14 = tpu.matmul %12, %1, %cst_11 {dimension_numbers = #tpu.dot_dimension_numbers<[1], [0], [0], [1], [0, 0, 1, 1], [], []>} : vector<8x32xbf16>, vector<32x128xbf16>, vector<8x128xf32> -> vector<8x128xf32>
    %15 = arith.addf %13, %14 : vector<8x128xf32>
    %16 = vector.broadcast %6 : vector<1x128xf32> to vector<8x128xf32>
    %17 = arith.addf %15, %16 : vector<8x128xf32>
    %cst_12 = arith.constant 5.000000e-01 : f32
    %18 = vector.broadcast %cst_12 : f32 to vector<8x128xf32>
    %19 = arith.mulf %18, %17 : vector<8x128xf32>
    %20 = math.tanh %19 : vector<8x128xf32>
    %cst_13 = arith.constant 5.000000e-01 : f32
    %21 = vector.broadcast %cst_13 : f32 to vector<8x128xf32>
    %22 = arith.mulf %21, %20 : vector<8x128xf32>
    %cst_14 = arith.constant 5.000000e-01 : f32
    %23 = vector.broadcast %cst_14 : f32 to vector<8x128xf32>
    %24 = arith.addf %22, %23 : vector<8x128xf32>
    %25 = arith.truncf %24 : vector<8x128xf32> to vector<8x128xbf16>
    %cst_15 = arith.constant dense<0.000000e+00> : vector<8x128xf32>
    %26 = tpu.matmul %25, %2, %cst_15 {dimension_numbers = #tpu.dot_dimension_numbers<[1], [0], [0], [1], [0, 0, 1, 1], [], []>} : vector<8x128xbf16>, vector<128x128xbf16>, vector<8x128xf32> -> vector<8x128xf32>
    %27 = vector.broadcast %7 : vector<1x128xf32> to vector<8x128xf32>
    %28 = arith.addf %26, %27 : vector<8x128xf32>
    %cst_16 = arith.constant 5.000000e-01 : f32
    %29 = vector.broadcast %cst_16 : f32 to vector<8x128xf32>
    %30 = arith.mulf %29, %28 : vector<8x128xf32>
    %31 = math.tanh %30 : vector<8x128xf32>
    %cst_17 = arith.constant 5.000000e-01 : f32
    %32 = vector.broadcast %cst_17 : f32 to vector<8x128xf32>
    %33 = arith.mulf %32, %31 : vector<8x128xf32>
    %cst_18 = arith.constant 5.000000e-01 : f32
    %34 = vector.broadcast %cst_18 : f32 to vector<8x128xf32>
    %35 = arith.addf %33, %34 : vector<8x128xf32>
    %36 = arith.truncf %35 : vector<8x128xf32> to vector<8x128xbf16>
    %cst_19 = arith.constant dense<0.000000e+00> : vector<8x128xf32>
    %37 = tpu.matmul %36, %3, %cst_19 {dimension_numbers = #tpu.dot_dimension_numbers<[1], [0], [0], [1], [0, 0, 1, 1], [], []>} : vector<8x128xbf16>, vector<128x128xbf16>, vector<8x128xf32> -> vector<8x128xf32>
    %38 = vector.broadcast %8 : vector<1x128xf32> to vector<8x128xf32>
    %39 = arith.addf %37, %38 : vector<8x128xf32>
    %cst_20 = arith.constant 5.000000e-01 : f32
    %40 = vector.broadcast %cst_20 : f32 to vector<8x128xf32>
    %41 = arith.mulf %40, %39 : vector<8x128xf32>
    %42 = math.tanh %41 : vector<8x128xf32>
    %cst_21 = arith.constant 5.000000e-01 : f32
    %43 = vector.broadcast %cst_21 : f32 to vector<8x128xf32>
    %44 = arith.mulf %43, %42 : vector<8x128xf32>
    %cst_22 = arith.constant 5.000000e-01 : f32
    %45 = vector.broadcast %cst_22 : f32 to vector<8x128xf32>
    %46 = arith.addf %44, %45 : vector<8x128xf32>
    %47 = arith.truncf %46 : vector<8x128xf32> to vector<8x128xbf16>
    %cst_23 = arith.constant dense<0.000000e+00> : vector<8x128xf32>
    %48 = tpu.matmul %47, %4, %cst_23 {dimension_numbers = #tpu.dot_dimension_numbers<[1], [0], [0], [1], [0, 0, 1, 1], [], []>} : vector<8x128xbf16>, vector<128x128xbf16>, vector<8x128xf32> -> vector<8x128xf32>
    %c0_24 = arith.constant 0 : index
    %c0_25 = arith.constant 0 : index
    %49 = vector.load %arg4[%c0_24, %c0_25] : memref<8x128xf32, #tpu.memory_space<vmem>>, vector<8x128xf32>
    tpu.vector_store %arg4[%c0_24, %c0_25], %48 {strides = array<i32>} : memref<8x128xf32, #tpu.memory_space<vmem>>, vector<8x128xf32>,
    return
  }
}

</mosaic_0001>

<bundles_post_ra>
// kernel: conditional_generator_forward.1
= control target key start
LH: loop header
LB: loop body
LE: loop exit
PB: predicated region body
PF: predicated region fallthrough
CT: control target
= control target key end

     0   :  { %9 = vsyncpa [#allocation3], 0  ;;  %s729_s15 = smov [#allocation2]   ;;  %s824_s0 = inlined_call_operand.vmem [shape: f32[8,64], index: 0, kind: input, shape index: {}]   ;;  %s825_s1 = inlined_call_operand.vmem [shape: f32[8,32], index: 1, kind: input, shape index: {}]   ;;  %s826_s2 = inlined_call_operand.hbm [shape: bf16[512,128], index: 2, kind: input, shape index: {}]   ;;  %s827_s3 = inlined_call_operand.vmem [shape: f32[8,128], index: 3, kind: input, shape index: {}]   ;;  %s828_s4 = inlined_call_operand.vmem [shape: f32[8,128], index: 4, kind: output, shape index: {}]  }
   0x1   :  { %s19_s16 = sshll.u32 %s729_s15, 4  ;;  %s20_s16 = int_to_ptr.vmem [resolvable:$true] %s19_s16 }
   0x2   :  { %s715_s17 = scalar_lea.vmem %s20_s16, 4096  ;;  %p720_p1 = scmp.lt.s32.totalorder %s20_s16, %s20_s16 }
   0x3   :  { %p716_p0 = scmp.ne.s32.totalorder %s20_s16, %s715_s17  ;;  %p721_p2 = scmp.lt.s32.totalorder %s715_s17, %s715_s17 }
   0x5   :  { %p722_p3 = por %p721_p2, %p720_p1 }
   0x7   :  { %p723_p4 = pnand %p722_p3, %p716_p0 }
   0x9   :  { %726 = shalt.err (!%p723_p4)
}
   0xa   :  { %s730_s18 = smov 64   ;;  %s731_s19 = smov 4  }
   0xb   :  { %25 = dma.hbm_to_vmem [thread:$0]  %s826_s2, 4096, %s20_s16, [#allocation3], %s730_s18, %s730_s18, %s731_s19  }
   0xc   :  { %727 = dma.done.wait [#allocation3], 4096  }
   0xd   :  { %728 = vsyncadd [#allocation3], 4294963200  ;;  %v732_v0 = vmov 0.0   ;;  %vm733_vm0 = vmmov 0   ;;  %v671_v1 = vld [vmem:[#allocation2 + $0x28] sm:$0xff]   ;;  %v672_v2 = vld [vmem:[#allocation2 + $0x20] sm:$0xff]   ;;  %v221_v23 = vlaneseq }
   0xe   :  { %586 = vmatprep.subr.bf16.mxu1 %v732_v0  ;;  %590 = vmatprep.mubr.msk.bf16.mxu1 %vm733_vm0, %v732_v0  ;;  %v95_v3 = vld [vmem:[%s825_s1] sm:$0xff]  ;;  %vm109_vm1 = vcmask 261120   ;;  %v673_v5 = vld [vmem:[#allocation2 + $0x18] sm:$0xff]   ;;  %v674_v6 = vld [vmem:[#allocation2 + $0x10] sm:$0xff]   ;;  %vm177_vm2 = vcmask 523264  }
   0xf   :  { %606 = vmatprep.subr.bf16.mxu0 %v732_v0  ;;  %622 = vmatprep.mubr.msk.bf16.mxu0 %vm733_vm0, %v732_v0  ;;  %v96_v4 = vpack.c.bf16 %v95_v3, %v95_v3  ;;  %v675_v7 = vld [vmem:[#allocation2 + $0x8] sm:$0xff]   ;;  %v676_v8 = vld [vmem:[#allocation2] sm:$0xff]   ;;  %v677_v11 = vld [vmem:[#allocation2 + $0x78] sm:$0xff]   ;;  %v794_v26 = vshrl.u32 %v221_v23, 7 }
  0x10   :  { %587 = vmatpush3.bf16.msra.mxu1 %v671_v1  ;;  %v93_v9 = vld [vmem:[%s824_s0] sm:$0xff]  ;;  %607 = vmatpush3.bf16.msra.mxu0 %v677_v11  ;;  %v678_v12 = vld [vmem:[#allocation2 + $0x70] sm:$0xff]   ;;  %v679_v13 = vld [vmem:[#allocation2 + $0x68] sm:$0xff]  }
  0x11   :  { %588 = vmatprep.subr.bf16.mxu1 %v732_v0  ;;  %v94_v10 = vpack.c.bf16 %v93_v9, %v93_v9  ;;  %608 = vmatprep.subr.bf16.mxu0 %v732_v0  ;;  %v680_v14 = vld [vmem:[#allocation2 + $0x60] sm:$0xff]   ;;  %v681_v15 = vld [vmem:[#allocation2 + $0x58] sm:$0xff]   ;;  %v682_v16 = vld [vmem:[#allocation2 + $0x50] sm:$0xff]   ;;  %v223_v27 = vsub.s32 0, %v794_v26  ;;  %v233_v49 = vsub.s32 1, %v794_v26 }
  0x12   :  { %v683_v17 = vld [vmem:[#allocation2 + $0x48] sm:$0xff]   ;;  %v684_v18 = vld [vmem:[#allocation2 + $0x40] sm:$0xff]   ;;  %v685_v19 = vld [vmem:[#allocation2 + $0xb8] sm:$0xff]  }
  0x13   :  { %v686_v20 = vld [vmem:[#allocation2 + $0xb0] sm:$0xff]   ;;  %v800_v28 = vld [vmem:[%s827_s3] sm:$0xff]  ;;  %v687_v41 = vld [vmem:[#allocation2 + $0xa8] sm:$0xff]  }
  0x14   :  { %589 = vmatpush3.bf16.msra.mxu1 %v672_v2  ;;  %609 = vmatpush3.bf16.msra.mxu0 %v678_v12  ;;  %v224_v29 = vrot.slane %v800_v28, %v223_v27  ;;  %v688_v42 = vld [vmem:[#allocation2 + $0xa0] sm:$0xff]   ;;  %v689_v43 = vld [vmem:[#allocation2 + $0x98] sm:$0xff]   ;;  %v690_v44 = vld [vmem:[#allocation2 + $0x90] sm:$0xff]   ;;  %v234_v50 = vrot.slane %v800_v28, %v233_v49 }
  0x15   :  { %594 = vmatprep.subr.bf16.mxu1 %v732_v0  ;;  %610 = vmatprep.subr.bf16.mxu0 %v732_v0  ;;  %v691_v45 = vld [vmem:[#allocation2 + $0x88] sm:$0xff]   ;;  %v692_v46 = vld [vmem:[#allocation2 + $0x80] sm:$0xff]   ;;  %v693_v47 = vld [vmem:[#allocation2 + $0xf8] sm:$0xff]  }
  0x16   :  { %v694_v48 = vld [vmem:[#allocation2 + $0xf0] sm:$0xff]   ;;  %v695_v61 = vld [vmem:[#allocation2 + $0xe8] sm:$0xff]   ;;  %v696_v62 = vld [vmem:[#allocation2 + $0xe0] sm:$0xff]  }
  0x17   :  { %591 = vmatmul.mubr.msk.bf16.vlgmr.msra.gmra.mxu1 %vm109_vm1, %v96_v4  ;;  %v697_v63 = vld [vmem:[#allocation2 + $0xd8] sm:$0xff]   ;;  %v698_v1 = vld [vmem:[#allocation2 + $0xd0] sm:$0xff]   ;;  %v699_v2 = vld [vmem:[#allocation2 + $0xc8] sm:$0xff]   ;;  %v330_v4 = vsub.s32 2, %v794_v26 }
  0x18   :  { %595 = vmatpush3.bf16.msra.mxu1 %v673_v5  ;;  %602 = vmatprep.mubr.msk.bf16.mxu1 %vm733_vm0, %v732_v0  ;;  %v700_v3 = vld [vmem:[#allocation2 + $0xc0] sm:$0xff]  }
  0x19   :  { %596 = vmatprep.subr.bf16.mxu1 %v732_v0  ;;  %611 = vmatpush3.bf16.msra.mxu0 %v679_v13  ;;  %v331_v5 = vrot.slane %v800_v28, %v330_v4 }
  0x1a   :  { %612 = vmatprep.subr.bf16.mxu0 %v732_v0 }
  0x1c   :  { %597 = vmatpush3.bf16.msra.mxu1 %v674_v6 }
  0x1d   :  { %598 = vmatprep.subr.bf16.mxu1 %v732_v0  ;;  %613 = vmatpush3.bf16.msra.mxu0 %v680_v14 }
  0x1e   :  { %614 = vmatprep.subr.bf16.mxu0 %v732_v0 }
  0x20   :  { %599 = vmatpush3.bf16.msra.mxu1 %v675_v7 }
  0x21   :  { %600 = vmatprep.subr.bf16.mxu1 %v732_v0  ;;  %615 = vmatpush3.bf16.msra.mxu0 %v681_v15 }
  0x22   :  { %616 = vmatprep.subr.bf16.mxu0 %v732_v0 }
  0x24   :  { %601 = vmatpush3.bf16.msra.mxu1 %v676_v8 }
  0x25   :  { %626 = vmatprep.subr.bf16.mxu1 %v732_v0  ;;  %617 = vmatpush3.bf16.msra.mxu0 %v682_v16 }
  0x26   :  { %618 = vmatprep.subr.bf16.mxu0 %v732_v0 }
  0x27   :  { %603 = vmatmul.mubr.msk.bf16.vlgmr.msra.gmra.mxu1 %vm177_vm2, %v94_v10 }
  0x28   :  { %642 = vmatprep.mubr.msk.bf16.mxu1 %vm733_vm0, %v732_v0  ;;  %627 = vmatpush3.bf16.msra.mxu1 %v685_v19 }
  0x29   :  { %619 = vmatpush3.bf16.msra.mxu0 %v683_v17  ;;  %628 = vmatprep.subr.bf16.mxu1 %v732_v0 }
  0x2a   :  { %620 = vmatprep.subr.bf16.mxu0 %v732_v0 }
  0x2c   :  { %629 = vmatpush3.bf16.msra.mxu1 %v686_v20 }
  0x2d   :  { %621 = vmatpush3.bf16.msra.mxu0 %v684_v18  ;;  %630 = vmatprep.subr.bf16.mxu1 %v732_v0 }
  0x2e   :  { %646 = vmatprep.subr.bf16.mxu0 %v732_v0 }
  0x30   :  { %631 = vmatpush3.bf16.msra.mxu1 %v687_v41 }
  0x31   :  { %632 = vmatprep.subr.bf16.mxu1 %v732_v0 }
  0x34   :  { %633 = vmatpush3.bf16.msra.mxu1 %v688_v42 }
  0x35   :  { %634 = vmatprep.subr.bf16.mxu1 %v732_v0 }
  0x38   :  { %635 = vmatpush3.bf16.msra.mxu1 %v689_v43 }
  0x39   :  { %636 = vmatprep.subr.bf16.mxu1 %v732_v0 }
  0x3c   :  { %637 = vmatpush3.bf16.msra.mxu1 %v690_v44 }
  0x3d   :  { %638 = vmatprep.subr.bf16.mxu1 %v732_v0 }
  0x40   :  { %639 = vmatpush3.bf16.msra.mxu1 %v691_v45 }
  0x41   :  { %640 = vmatprep.subr.bf16.mxu1 %v732_v0 }
  0x44   :  { %641 = vmatpush3.bf16.msra.mxu1 %v692_v46 }
  0xd7   :  { %v147_v21 = vpop.f32.mrf.mxu1 }
  0xd9   :  { %v592_v22 = vpop.f32.mrf.mxu1 }
  0xdb   :  { %v150_v24 = vpop.f32.mrf.mxu1 }
  0xdd   :  { %v593_v25 = vpop.f32.mrf.mxu1 }
  0xe7   :  { %v215_v30 = vpop.f32.mrf.mxu1 }
  0xe8   :  { %v216_v31 = vadd.f32 %v215_v30, %v147_v21 }
  0xe9   :  { %v604_v32 = vpop.f32.mrf.mxu1 }
  0xea   :  { %v225_v33 = vadd.f32 %v224_v29, %v216_v31 }
  0xeb   :  { %v218_v34 = vpop.f32.mrf.mxu1 }
  0xec   :  { %v226_v35 = vmul.f32 0.5, %v225_v33 }
  0xed   :  { %v605_v36 = vpop.f32.mrf.mxu1 }
  0xee   :  { %701 = vtanh.f32 %v226_v35 }
  0xfb   :  { %v702_v37 = vpop.eup %701 }
  0xfc   :  { %v228_v38 = vmul.f32 0.5, %v702_v37 }
  0xfe   :  { %v229_v39 = vadd.f32 0.5, %v228_v38 }
 0x100   :  { %v230_v40 = vpack.c.bf16 %v229_v39, %v229_v39 }
 0x102   :  { %623 = vmatmul.mubr.bf16.vlgmr.msra.gmra.mxu0 %v230_v40 }
 0x103   :  { %662 = vmatprep.mubr.msk.bf16.mxu0 %vm733_vm0, %v732_v0  ;;  %647 = vmatpush3.bf16.msra.mxu0 %v693_v47 }
 0x104   :  { %648 = vmatprep.subr.bf16.mxu0 %v732_v0 }
 0x107   :  { %649 = vmatpush3.bf16.msra.mxu0 %v694_v48 }
 0x108   :  { %650 = vmatprep.subr.bf16.mxu0 %v732_v0 }
 0x10b   :  { %651 = vmatpush3.bf16.msra.mxu0 %v695_v61 }
 0x10c   :  { %652 = vmatprep.subr.bf16.mxu0 %v732_v0 }
 0x10f   :  { %653 = vmatpush3.bf16.msra.mxu0 %v696_v62 }
 0x110   :  { %654 = vmatprep.subr.bf16.mxu0 %v732_v0 }
 0x113   :  { %655 = vmatpush3.bf16.msra.mxu0 %v697_v63 }
 0x114   :  { %656 = vmatprep.subr.bf16.mxu0 %v732_v0 }
 0x117   :  { %657 = vmatpush3.bf16.msra.mxu0 %v698_v1 }
 0x118   :  { %658 = vmatprep.subr.bf16.mxu0 %v732_v0 }
 0x11b   :  { %659 = vmatpush3.bf16.msra.mxu0 %v699_v2 }
 0x11c   :  { %660 = vmatprep.subr.bf16.mxu0 %v732_v0 }
 0x11f   :  { %661 = vmatpush3.bf16.msra.mxu0 %v700_v3 }
 0x1c2   :  { %v317_v51 = vpop.f32.mrf.mxu0 }
 0x1c3   :  { %v318_v52 = vadd.f32 %v317_v51, %v234_v50 }
 0x1c4   :  { %v624_v53 = vpop.f32.mrf.mxu0 }
 0x1c5   :  { %v323_v54 = vmul.f32 0.5, %v318_v52 }
 0x1c6   :  { %v320_v55 = vpop.f32.mrf.mxu0 }
 0x1c7   :  { %703 = vtanh.f32 %v323_v54 }
 0x1c8   :  { %v625_v56 = vpop.f32.mrf.mxu0 }
 0x1d4   :  { %v704_v57 = vpop.eup %703 }
 0x1d5   :  { %v325_v58 = vmul.f32 0.5, %v704_v57 }
 0x1d7   :  { %v326_v59 = vadd.f32 0.5, %v325_v58 }
 0x1d9   :  { %v327_v60 = vpack.c.bf16 %v326_v59, %v326_v59 }
 0x1db   :  { %643 = vmatmul.mubr.bf16.vlgmr.msra.gmra.mxu1 %v327_v60 }
 0x29b   :  { %v414_v6 = vpop.f32.mrf.mxu1 }
 0x29c   :  { %v415_v7 = vadd.f32 %v414_v6, %v331_v5 }
 0x29d   :  { %v644_v8 = vpop.f32.mrf.mxu1 }
 0x29e   :  { %v420_v9 = vmul.f32 0.5, %v415_v7 }
 0x29f   :  { %v417_v10 = vpop.f32.mrf.mxu1 }
 0x2a0   :  { %705 = vtanh.f32 %v420_v9 }
 0x2a1   :  { %v645_v11 = vpop.f32.mrf.mxu1 }
 0x2ad   :  { %v706_v12 = vpop.eup %705 }
 0x2ae   :  { %v422_v13 = vmul.f32 0.5, %v706_v12 }
 0x2b0   :  { %v423_v14 = vadd.f32 0.5, %v422_v13 }
 0x2b2   :  { %v424_v15 = vpack.c.bf16 %v423_v14, %v423_v14 }
 0x2b4   :  { %663 = vmatmul.mubr.bf16.vlgmr.msra.gmra.mxu0 %v424_v15 }
 0x374   :  { %v507_v16 = vpop.f32.mrf.mxu0 }
 0x375   :  { %513 = vst [vmem:[%s828_s4] sm:$0xff] %v507_v16 }
 0x376   :  { %v664_v0 = vpop.f32.mrf.mxu0 }
 0x378   :  { %v510_v17 = vpop.f32.mrf.mxu0 }
 0x37a   :  { %v665_v18 = vpop.f32.mrf.mxu0 }
 0x37b   :  { %518 = vsyncpa [#allocation3], 1 }

</bundles_post_ra>
